<compile_context>
chip_gen: v7x
topology: tpu7x:2x2x1
jax: 0.10.0
libtpu: 0.0.40
codegen_flags: <defaults>
</compile_context>

<pallas_src>
import jax
import jax.numpy as jnp
from jax.experimental import pallas as pl
from jax.experimental.pallas import tpu as pltpu


# ----------------------------- Fused kernel -------------------------------- #

def _encoder_kernel(counts_ref, a_ref, h0_ref, w_ref, b_ref, o_ref, h_cur):
    """One grid step = one (graph g, layer l) pair.   Grid = (G, L), L inner.

    Per step (reassociated (A @ H) @ W == A @ (H @ W)):
        hw     = bf16( h_cur @ W_l )                (MXU bf16, f32 accumulate)
        h_new  = relu( A_gg @ hw + b_l )            (MXU bf16, f32 accumulate)
        h_cur  = bf16(h_new)                        (persists across the L axis)
    On the last layer the per-graph mean readout is written straight into the
    resident output block:  o[g] = sum_rows(h_new) / count_g.
    """
    gi = pl.program_id(0)
    li = pl.program_id(1)
    nl = pl.num_programs(1)

    # Layer-0 init: stage this graph's input features into the bf16 scratch.
    @pl.when(li == 0)
    def _():
        h_cur[...] = h0_ref[...]

    hw = jnp.dot(h_cur[...], w_ref[0],
                 preferred_element_type=jnp.float32).astype(jnp.bfloat16)
    h_new = jnp.maximum(
        jnp.dot(a_ref[...], hw, preferred_element_type=jnp.float32)
        + b_ref[0],
        0.0)
    h_cur[...] = h_new.astype(jnp.bfloat16)

    # Mean readout folded into the last layer's step (output block is resident
    # across the L axis; written exactly once per graph, in f32).
    @pl.when(li == nl - 1)
    def _():
        cnt = counts_ref[gi].astype(jnp.float32)
        o_ref[0] = jnp.sum(h_new, axis=0, keepdims=True) / cnt


# ------------------------------- Wrapper ------------------------------------ #

def _vmem_limit_bytes():
    try:
        cap = int(pltpu.get_tpu_info().vmem_capacity_bytes)
    except Exception:
        cap = 64 * 1024 * 1024          # conservative (v7x-sized) fallback
    # ~60% of physical VMEM: ~76 MiB on v5e/v6e (128 MiB), ~38 MiB on v7x (64 MiB).
    return min(int(cap * 0.6), 80 * 1024 * 1024)


@jax.jit
def encoder_forward(a_hat, h0, counts, weights, biases):
    """Encoder.forward: L graph layers + per-graph mean readout, one kernel."""
    n, d = h0.shape
    g = counts.shape[0]
    num_layers = len(weights)
    assert n % g == 0, "batched graph must have equal-size component graphs here"
    p = n // g                                   # nodes per component graph
    assert p % 128 == 0 and d % 128 == 0, "per-graph block must be tile aligned"

    a_bf16 = a_hat.astype(jnp.bfloat16)
    h0_bf16 = h0.astype(jnp.bfloat16)
    w_stack = jnp.stack([w.astype(jnp.bfloat16) for w in weights])              # [L,D,D]
    b_stack = jnp.stack([b.reshape(1, d).astype(jnp.float32) for b in biases])  # [L,1,D]

    grid = (g, num_layers)                       # L innermost -> A_gg reused L times

    flops = g * num_layers * (2 * p * d * d + 2 * p * p * d) + g * 2 * p * d
    bytes_accessed = (g * p * p * 2                              # diagonal A blocks, once
                      + n * d * 2                                # H0 (bf16), once
                      + g * num_layers * (d * d * 2 + d * 4)     # W_l / b_l per (g, l)
                      + g * d * 4 + g * 4)                       # output + counts

    out = pl.pallas_call(
        _encoder_kernel,
        out_shape=jax.ShapeDtypeStruct((g, 1, d), jnp.float32),
        grid_spec=pltpu.PrefetchScalarGridSpec(
            num_scalar_prefetch=1,               # per-graph node counts (SMEM)
            grid=grid,
            in_specs=[
                # Block-diagonal skip: only the (g, g) diagonal A_hat block is
                # ever fetched; index independent of l -> fetched once per graph.
                pl.BlockSpec((p, p), lambda gi, li, cnt: (gi, gi)),
                # This graph's input features (also fetched once per graph).
                pl.BlockSpec((p, d), lambda gi, li, cnt: (gi, 0)),
                pl.BlockSpec((1, d, d), lambda gi, li, cnt: (li, 0, 0)),   # W_l
                pl.BlockSpec((1, 1, d), lambda gi, li, cnt: (li, 0, 0)),   # b_l
            ],
            out_specs=pl.BlockSpec((1, 1, d), lambda gi, li, cnt: (gi, 0, 0)),
            scratch_shapes=[
                pltpu.VMEM((p, d), jnp.bfloat16),   # h_cur, persists across layers
            ],
        ),
        compiler_params=pltpu.CompilerParams(
            # Graphs are independent (own h_cur init, disjoint output blocks)
            # -> the G axis may be sharded across v7x's two TensorCores.  The L
            # axis carries h_cur and the resident output block -> sequential.
            dimension_semantics=("parallel", "arbitrary"),
            vmem_limit_bytes=_vmem_limit_bytes(),
        ),
        cost_estimate=pl.CostEstimate(flops=flops, transcendentals=0,
                                      bytes_accessed=bytes_accessed),
    )(counts.astype(jnp.int32), a_bf16, h0_bf16, w_stack, b_stack)
    return out.reshape(g, d)


# ------------------------------ References ---------------------------------- #

def encoder_reference_bf16(a_hat, seg, h0, weights, biases):
    """Emulates the kernel numerics (bf16 MXU operands, f32 accumulation)."""
    a = a_hat.astype(jnp.bfloat16)
    h = h0.astype(jnp.float32)
    for w, b in zip(weights, biases):
        hw = jnp.dot(h.astype(jnp.bfloat16), w.astype(jnp.bfloat16),
                     preferred_element_type=jnp.float32).astype(jnp.bfloat16)
        h = jnp.maximum(jnp.dot(a, hw, preferred_element_type=jnp.float32)
                        + b.reshape(1, -1), 0.0)
    return jnp.dot(seg, h, preferred_element_type=jnp.float32)


def encoder_reference_f32(a_hat, seg, h0, weights, biases):
    h = h0
    for w, b in zip(weights, biases):
        h = jnp.maximum(a_hat @ h @ w + b.reshape(1, -1), 0.0)
    return seg @ h


# --------------------------------- Main -------------------------------------- #

if __name__ == "__main__":
    key = jax.random.PRNGKey(0)

    num_graphs = 2               # batched DGL graph with 2 component graphs
    nodes_per_graph = 128
    n_nodes = num_graphs * nodes_per_graph     # 256
    hidden = 128                               # lane-dense feature dim
    num_layers = 2

    k_h, k_a, k_w = jax.random.split(key, 3)

    # Node features h: [N, D]
    h0 = jax.random.normal(k_h, (n_nodes, hidden), dtype=jnp.float32)

    # Block-diagonal adjacency (edges only within each component graph),
    # plus self-loops, row-normalized -> A_hat.
    rand = jax.random.uniform(k_a, (n_nodes, n_nodes))
    block_mask = jnp.zeros((n_nodes, n_nodes), dtype=jnp.float32)
    for gi in range(num_graphs):
        s = gi * nodes_per_graph
        block_mask = block_mask.at[s:s + nodes_per_graph,
                                   s:s + nodes_per_graph].set(1.0)
    adj = (rand < 0.1).astype(jnp.float32) * block_mask
    adj = adj + jnp.eye(n_nodes, dtype=jnp.float32)        # self loops
    a_hat = adj / jnp.sum(adj, axis=1, keepdims=True)      # row-normalize

    # Per-graph node counts (for the mean readout).
    counts = jnp.full((num_graphs,), nodes_per_graph, dtype=jnp.int32)

    # Segment-mean matrix S: [G, N] (used only by the references).
    seg = jnp.zeros((num_graphs, n_nodes), dtype=jnp.float32)
    for gi in range(num_graphs):
        s = gi * nodes_per_graph
        seg = seg.at[gi, s:s + nodes_per_graph].set(1.0 / nodes_per_graph)

    # Per-layer parameters (clones share shapes, not values — matches
    # deepcopy-then-train semantics; values here are synthetic).
    weights, biases = [], []
    wkeys = jax.random.split(k_w, num_layers)
    for li in range(num_layers):
        weights.append(jax.random.normal(wkeys[li], (hidden, hidden),
                                         dtype=jnp.float32) * 0.1)
        biases.append(jnp.full((1, hidden), 0.01 * (li + 1), dtype=jnp.float32))

    # TODO(synk): the original `encoder_layer` is an abstract DGL layer; a
    # normalized-adjacency GraphConv is used as the concrete instantiation.

    out = encoder_forward(a_hat, h0, counts, weights, biases)
    out = jax.block_until_ready(out)

    ref_bf16 = encoder_reference_bf16(a_hat, seg, h0, weights, biases)
    ref_f32 = encoder_reference_f32(a_hat, seg, h0, weights, biases)

    assert out.shape == (num_graphs, hidden)
    assert jnp.allclose(out, ref_bf16, atol=1e-3, rtol=1e-3), (
        "max err vs bf16 ref:", float(jnp.max(jnp.abs(out - ref_bf16))))
    assert jnp.allclose(out, ref_f32, atol=5e-2, rtol=5e-2), (
        "max err vs f32 ref:", float(jnp.max(jnp.abs(out - ref_f32))))

    print("KERNEL_OK")
</pallas_src>

<mosaic_0001>
module attributes {stable_mosaic.version = 11 : i64} {
  func.func @_encoder_kernel(%arg0: i32, %arg1: i32, %arg2: memref<2xi32, #tpu.memory_space<smem>>, %arg3: memref<128x128xbf16, #tpu.memory_space<vmem>>, %arg4: memref<128x128xbf16, #tpu.memory_space<vmem>>, %arg5: memref<1x128x128xbf16, #tpu.memory_space<vmem>>, %arg6: memref<1x1x128xf32, #tpu.memory_space<vmem>>, %arg7: memref<1x1x128xf32, #tpu.memory_space<vmem>>, %arg8: memref<128x128xbf16, #tpu.memory_space<vmem>>) attributes {dimension_semantics = [#tpu.dimension_semantics<parallel>, #tpu.dimension_semantics<arbitrary>], iteration_bounds = array<i64: 2, 2>, scalar_prefetch = 1 : i64, scratch_operands = 1 : i64, tpu.core_type = #tpu.core_type<tc>, window_params = [{transform_indices = @transform_0, window_bounds = array<i64: 128, 128>}, {transform_indices = @transform_1, window_bounds = array<i64: 128, 128>}, {transform_indices = @transform_2, window_bounds = array<i64: 1, 128, 128>}, {transform_indices = @transform_3, window_bounds = array<i64: 1, 1, 128>}, {transform_indices = @transform_4, window_bounds = array<i64: 1, 1, 128>}]} {
    %c0_i32 = arith.constant 0 : i32
    %0 = arith.cmpi eq, %arg1, %c0_i32 : i32
    %1 = arith.extui %0 : i1 to i32
    %c0_i32_0 = arith.constant 0 : i32
    %2 = arith.cmpi ne, %1, %c0_i32_0 : i32
    scf.if %2 {
      %c0_15 = arith.constant 0 : index
      %c0_16 = arith.constant 0 : index
      %21 = vector.load %arg4[%c0_15, %c0_16] : memref<128x128xbf16, #tpu.memory_space<vmem>>, vector<128x128xbf16>
      %c0_17 = arith.constant 0 : index
      %c0_18 = arith.constant 0 : index
      %22 = vector.load %arg8[%c0_17, %c0_18] : memref<128x128xbf16, #tpu.memory_space<vmem>>, vector<128x128xbf16>
      tpu.vector_store %arg8[%c0_17, %c0_18], %21 {strides = array<i32>} : memref<128x128xbf16, #tpu.memory_space<vmem>>, vector<128x128xbf16>,
    } else {
    }
    %c0 = arith.constant 0 : index
    %c0_1 = arith.constant 0 : index
    %3 = vector.load %arg8[%c0, %c0_1] : memref<128x128xbf16, #tpu.memory_space<vmem>>, vector<128x128xbf16>
    %c0_2 = arith.constant 0 : index
    %c0_3 = arith.constant 0 : index
    %c0_4 = arith.constant 0 : index
    %4 = vector.load %arg5[%c0_2, %c0_3, %c0_4] : memref<1x128x128xbf16, #tpu.memory_space<vmem>>, vector<1x128x128xbf16>
    %5 = vector.shape_cast %4 : vector<1x128x128xbf16> to vector<128x128xbf16>
    %cst = arith.constant dense<0.000000e+00> : vector<128x128xf32>
    %6 = tpu.matmul %3, %5, %cst {dimension_numbers = #tpu.dot_dimension_numbers<[1], [0], [0], [1], [0, 0, 1, 1], [], []>} : vector<128x128xbf16>, vector<128x128xbf16>, vector<128x128xf32> -> vector<128x128xf32>
    %7 = arith.truncf %6 : vector<128x128xf32> to vector<128x128xbf16>
    %c0_5 = arith.constant 0 : index
    %c0_6 = arith.constant 0 : index
    %8 = vector.load %arg3[%c0_5, %c0_6] : memref<128x128xbf16, #tpu.memory_space<vmem>>, vector<128x128xbf16>
    %cst_7 = arith.constant dense<0.000000e+00> : vector<128x128xf32>
    %9 = tpu.matmul %8, %7, %cst_7 {dimension_numbers = #tpu.dot_dimension_numbers<[1], [0], [0], [1], [0, 0, 1, 1], [], []>} : vector<128x128xbf16>, vector<128x128xbf16>, vector<128x128xf32> -> vector<128x128xf32>
    %c0_8 = arith.constant 0 : index
    %c0_9 = arith.constant 0 : index
    %c0_10 = arith.constant 0 : index
    %10 = vector.load %arg6[%c0_8, %c0_9, %c0_10] : memref<1x1x128xf32, #tpu.memory_space<vmem>>, vector<1x1x128xf32>
    %11 = vector.shape_cast %10 : vector<1x1x128xf32> to vector<1x128xf32>
    %12 = vector.broadcast %11 : vector<1x128xf32> to vector<128x128xf32>
    %13 = arith.addf %9, %12 : vector<128x128xf32>
    %cst_11 = arith.constant 0.000000e+00 : f32
    %14 = vector.broadcast %cst_11 : f32 to vector<128x128xf32>
    %15 = arith.maximumf %13, %14 : vector<128x128xf32>
    %16 = arith.truncf %15 : vector<128x128xf32> to vector<128x128xbf16>
    %c0_12 = arith.constant 0 : index
    %c0_13 = arith.constant 0 : index
    %17 = vector.load %arg8[%c0_12, %c0_13] : memref<128x128xbf16, #tpu.memory_space<vmem>>, vector<128x128xbf16>
    tpu.vector_store %arg8[%c0_12, %c0_13], %16 {strides = array<i32>} : memref<128x128xbf16, #tpu.memory_space<vmem>>, vector<128x128xbf16>,
    %c1_i32 = arith.constant 1 : i32
    %18 = arith.cmpi eq, %arg1, %c1_i32 : i32
    %19 = arith.extui %18 : i1 to i32
    %c0_i32_14 = arith.constant 0 : i32
    %20 = arith.cmpi ne, %19, %c0_i32_14 : i32
    scf.if %20 {
      %21 = arith.index_cast %arg0 : i32 to index
      %22 = memref.load %arg2[%21] : memref<2xi32, #tpu.memory_space<smem>>
      %23 = arith.sitofp %22 : i32 to f32
      %cst_15 = arith.constant dense<0.000000e+00> : vector<128xf32>
      %24 = vector.multi_reduction <add>, %15, %cst_15 [0] : vector<128x128xf32> to vector<128xf32>
      %25 = vector.shape_cast %24 : vector<128xf32> to vector<1x128xf32>
      %26 = vector.broadcast %23 : f32 to vector<1x128xf32>
      %27 = arith.divf %25, %26 : vector<1x128xf32>
      %c0_16 = arith.constant 0 : index
      %c0_17 = arith.constant 0 : index
      %c0_18 = arith.constant 0 : index
      %28 = vector.load %arg7[%c0_16, %c0_17, %c0_18] : memref<1x1x128xf32, #tpu.memory_space<vmem>>, vector<1x1x128xf32>
      %29 = vector.shape_cast %28 : vector<1x1x128xf32> to vector<1x128xf32>
      %30 = vector.shape_cast %27 : vector<1x128xf32> to vector<1x1x128xf32>
      tpu.vector_store %arg7[%c0_16, %c0_17, %c0_18], %30 {strides = array<i32>} : memref<1x1x128xf32, #tpu.memory_space<vmem>>, vector<1x1x128xf32>,
    } else {
    }
    return
  }
  func.func @transform_0(%arg0: i32, %arg1: i32, %arg2: memref<2xi32, #tpu.memory_space<smem>>) -> (i32, i32) {
    %c0_i32 = arith.constant 0 : i32
    return %arg0, %arg0 : i32, i32
  }
  func.func @transform_1(%arg0: i32, %arg1: i32, %arg2: memref<2xi32, #tpu.memory_space<smem>>) -> (i32, i32) {
    %c0_i32 = arith.constant 0 : i32
    %c0_i32_0 = arith.constant 0 : i32
    return %arg0, %c0_i32 : i32, i32
  }
  func.func @transform_2(%arg0: i32, %arg1: i32, %arg2: memref<2xi32, #tpu.memory_space<smem>>) -> (i32, i32, i32) {
    %c0_i32 = arith.constant 0 : i32
    %c0_i32_0 = arith.constant 0 : i32
    %c0_i32_1 = arith.constant 0 : i32
    return %arg1, %c0_i32, %c0_i32_0 : i32, i32, i32
  }
  func.func @transform_3(%arg0: i32, %arg1: i32, %arg2: memref<2xi32, #tpu.memory_space<smem>>) -> (i32, i32, i32) {
    %c0_i32 = arith.constant 0 : i32
    %c0_i32_0 = arith.constant 0 : i32
    %c0_i32_1 = arith.constant 0 : i32
    return %arg1, %c0_i32, %c0_i32_0 : i32, i32, i32
  }
  func.func @transform_4(%arg0: i32, %arg1: i32, %arg2: memref<2xi32, #tpu.memory_space<smem>>) -> (i32, i32, i32) {
    %c0_i32 = arith.constant 0 : i32
    %c0_i32_0 = arith.constant 0 : i32
    %c0_i32_1 = arith.constant 0 : i32
    return %arg0, %c0_i32, %c0_i32_0 : i32, i32, i32
  }
}

</mosaic_0001>

<bundles_post_ra>
// kernel: encoder_forward.1
= control target key start
LH: loop header
LB: loop body
LE: loop exit
PB: predicated region body
PF: predicated region fallthrough
CT: control target
= control target key end

     0   :  { %s1640_s0 = inlined_call_operand.vmem [shape: s32[2], index: 0, kind: input, shape index: {}]   ;;  %s1641_s1 = inlined_call_operand.vmem [shape: bf16[256,256], index: 1, kind: input, shape index: {}]   ;;  %s1642_s2 = inlined_call_operand.vmem [shape: bf16[256,128], index: 2, kind: input, shape index: {}]   ;;  %s1643_s3 = inlined_call_operand.vmem [shape: bf16[2,128,128], index: 3, kind: input, shape index: {}]   ;;  %s1644_s4 = inlined_call_operand.vmem [shape: f32[2,1,128], index: 4, kind: input, shape index: {}]   ;;  %s1645_s5 = inlined_call_operand.hbm [shape: f32[2,1,128], index: 5, kind: output, shape index: {}]  }
   0x1   :  { %1650 = sst [smem:[#allocation16_spill]] %s1641_s1  ;;  %s10_s20 = sshll.u32 %s1640_s0, 4  ;;  %s11_s20 = int_to_ptr.vmem [resolvable:$true] %s10_s20 }
   0x2   :  { %s1238_s21 = scalar_lea.vmem %s11_s20, 16  ;;  %p1243_p1 = scmp.lt.s32.totalorder %s11_s20, %s11_s20 }
   0x3   :  { %p1239_p0 = scmp.ne.s32.totalorder %s11_s20, %s1238_s21  ;;  %p1244_p2 = scmp.lt.s32.totalorder %s1238_s21, %s1238_s21 }
   0x5   :  { %p1245_p3 = por %p1244_p2, %p1243_p1 }
   0x7   :  { %p1246_p4 = pnand %p1245_p3, %p1239_p0 }
   0x9   :  { %1249 = shalt.err (!%p1246_p4)  }
   0xa   :  { %s1364_s22 = smov [#allocation4]  }
   0xb   :  { %13 = dma.vmem_to_smem %s11_s20, 16, %s1364_s22, [#allocation3] }
   0xc   :  { %1318 = dma.done.wait [#allocation3], 16 }
   0xd   :  { %1319 = vsyncadd [#allocation3], 4294967280 }
   0xe   :  { %15 = sfence }
   0xf   :  { %16 = vsyncpa [#allocation7], 0 }
  0x10   :  { %18 = vsyncpa [#allocation7 + $0x1], 0  ;;  %s1399_s23 = smov 0   ;;  %s1401_s24 = smov 0  }
  0x11   :  { %s1403_s0 = smov 0   ;;  %s1405_s25 = smov 0  }
  0x12   :  { %s1407_s26 = smov 0   ;;  %s1409_s27 = smov 0  }
  0x13   :  { %s1411_s28 = smov 0   ;;  %s1413_s29 = smov 0  }
  0x14   :  { %s1415_s30 = smov 0   ;;  %s1417_s6 = smov 0  }
  0x15 LB: > { %1651 = sst [smem:[#allocation10_spill]] %s1342_s26  ;;  %s982_s7 = sadd.s32 4294967295, %s1362_s6   ;;  %s1362_s6 = sphi %s1417_s6, %s24_s6   ;;  %s1358_s30 = sphi %s1415_s30, %s1668_s30   ;;  %s1354_s29 = sphi %s1413_s29, %s1667_s29   ;;  %s1350_s28 = sphi %s1411_s28, %s1666_s28   ;;  %s1346_s27 = sphi %s1409_s27, %s1665_s27   ;;  %s1342_s26 = sphi %s1407_s26, %s1664_s26   ;;  %s1338_s25 = sphi %s1405_s25, %s1663_s25   ;;  %s1334_s0 = sphi %s1403_s0, %s1671_s0   ;;  %s1330_s24 = sphi %s1401_s24, %s1670_s24   ;;  %s1326_s23 = sphi %s1399_s23, %s1669_s23  }
  0x16   : > { %1652 = sst [smem:[#allocation11_spill]] %s1354_s29  ;;  %s983_s8 = sadd.s32 4294967294, %s1362_s6  }
  0x17   : > { %1653 = sst [smem:[#allocation12_spill]] %s1358_s30  ;;  %s33_s9 = sadd.s32 1, %s1354_s29 }
  0x18   : > { %p34_p5 = scmp.ge.s32.totalorder %s33_s9, 2  ;;  %s36_s10 = sadd.s32 1, %s1358_s30 }
  0x19   : > { %p52_p6 = scmp.ne.s32.totalorder %s1342_s26, %s1338_s25  ;;  %p53_p7 = scmp.eq.s32.totalorder %s1362_s6, 0 }
  0x1a   : > { %s1673_s9 = smov (%p34_p5, %s33_s9), 0  ;;  %s1675_s10 = smov (!%p34_p5, %s36_s10), %s1358_s30 }
  0x1b   : > { %1654 = sst [smem:[#allocation13_spill]] %s1673_s9  ;;  %s45_s11 = sadd.s32 1, %s1342_s26 }
  0x1c   : > { %p1460_p8 = por %p53_p7, %p52_p6  ;;  %p38_p9 = scmp.ge.s32.totalorder %s1675_s10, 2 }
  0x1d   : > { %p159_p10 = scmp.ne.s32.totalorder %s1334_s0, %s1330_s24  ;;  %p160_p11 = scmp.eq.s32.totalorder %s982_s7, 3 }
  0x1e   : > { %p165_p12 = scmp.ne.s32.totalorder %s1330_s24, %s1326_s23  ;;  %s1677_s10 = smov (%p38_p9, %s1675_s10), 0 }
  0x1f   : > { %1656 = sst [smem:[#allocation14_spill]] %s1677_s10  ;;  %p1470_p13 = por %p160_p11, %p159_p10 }
  0x20   : > { %p166_p0 = scmp.eq.s32.totalorder %s983_s8, 3  ;;  %s40_s14 = ssub.s32 %s1358_s30, %s1677_s10 }
  0x21   : > { %s149_s15 = sadd.s32 1, %s1334_s0  ;;  %s42_s16 = sor.u32 %s40_s14, %s40_s14 }
  0x22   : > { %p147_p1 = scmp.eq.s32.totalorder %s40_s14, 0  ;;  %p43_p2 = scmp.eq.s32.totalorder %s42_s16, 0 }
  0x23   : > { %p1477_p3 = por %p166_p0, %p165_p12  ;;  %p985_p4 = scmp.ge.s32.totalorder %s1362_s6, 4 }
  0x24   : > { %s1482_s18 = scalar_select %p147_p1, %s1334_s0, %s149_s15  }
  0x25   : > { %s1485_s19 = scalar_select %p43_p2, %s1342_s26, %s45_s11  }
  0x26   : > { %182 = sbr.rel (%p985_p4) target bundleno = 65 (0x41), region = 16 }
  0x27   : > { %1659 = sst [smem:[#allocation15_spill]] %s1485_s19 }
  0x2d   : > { %185 = sbr.rel (!%p1460_p8) target bundleno = 65 (0x41), region = 20  ;;  %s187_s20 = sand.u32 (%p1460_p8), 1, %s1342_s26  }
  0x2e   : > { %s1026_s21 = sshll.u32 (%p1460_p8), %s1358_s30, 5  ;;  %s986_s22 = sshll.u32 (%p1460_p8), %s187_s20, 6 }
  0x2f   : > { %s192_s7 = sadd.s32 (%p1460_p8), %s1358_s30, %s1026_s21  ;;  %s1660_s1 = sld [smem:[#allocation16_spill]] (%p1460_p8) }
  0x30   : > { %s989_s8 = sshll.u32 (%p1460_p8), %s192_s7, 2  ;;  %s189_s11 = scalar_lea.vmem (%p1460_p8), [#allocation5], %s986_s22 }
  0x35   : > { %s1496_s15 = scalar_lea.vmem %s1660_s1, %s989_s8 }
  0x36   : > { %v210_v0 = vld [vmem:[%s1496_s15] sm:$0xf]  ;;  %v212_v1 = vld [vmem:[%s1496_s15 + $0x8] sm:$0xf]  ;;  %v214_v2 = vld [vmem:[%s1496_s15 + $0x10] sm:$0xf] }
  0x37   : > { %211 = vst [vmem:[%s189_s11] sm:$0xf] %v210_v0  ;;  %213 = vst [vmem:[%s189_s11 + $0x4] sm:$0xf] %v212_v1  ;;  %v216_v3 = vld [vmem:[%s1496_s15 + $0x18] sm:$0xf] }
  0x38   : > { %215 = vst [vmem:[%s189_s11 + $0x8] sm:$0xf] %v214_v2  ;;  %v218_v4 = vld [vmem:[%s1496_s15 + $0x20] sm:$0xf]  ;;  %v220_v5 = vld [vmem:[%s1496_s15 + $0x28] sm:$0xf] }
  0x39   : > { %217 = vst [vmem:[%s189_s11 + $0xc] sm:$0xf] %v216_v3  ;;  %219 = vst [vmem:[%s189_s11 + $0x10] sm:$0xf] %v218_v4  ;;  %v222_v6 = vld [vmem:[%s1496_s15 + $0x30] sm:$0xf] }
  0x3a   : > { %221 = vst [vmem:[%s189_s11 + $0x14] sm:$0xf] %v220_v5  ;;  %v224_v7 = vld [vmem:[%s1496_s15 + $0x38] sm:$0xf]  ;;  %v226_v8 = vld [vmem:[%s1496_s15 + $0x40] sm:$0xf] }
  0x3b   : > { %223 = vst [vmem:[%s189_s11 + $0x18] sm:$0xf] %v222_v6  ;;  %225 = vst [vmem:[%s189_s11 + $0x1c] sm:$0xf] %v224_v7  ;;  %v228_v9 = vld [vmem:[%s1496_s15 + $0x48] sm:$0xf] }
  0x3c   : > { %227 = vst [vmem:[%s189_s11 + $0x20] sm:$0xf] %v226_v8  ;;  %v230_v10 = vld [vmem:[%s1496_s15 + $0x50] sm:$0xf]  ;;  %v232_v11 = vld [vmem:[%s1496_s15 + $0x58] sm:$0xf] }
  0x3d   : > { %229 = vst [vmem:[%s189_s11 + $0x24] sm:$0xf] %v228_v9  ;;  %231 = vst [vmem:[%s189_s11 + $0x28] sm:$0xf] %v230_v10  ;;  %v234_v12 = vld [vmem:[%s1496_s15 + $0x60] sm:$0xf] }
  0x3e   : > { %233 = vst [vmem:[%s189_s11 + $0x2c] sm:$0xf] %v232_v11  ;;  %v236_v13 = vld [vmem:[%s1496_s15 + $0x68] sm:$0xf]  ;;  %v238_v14 = vld [vmem:[%s1496_s15 + $0x70] sm:$0xf] }
  0x3f   : > { %235 = vst [vmem:[%s189_s11 + $0x30] sm:$0xf] %v234_v12  ;;  %237 = vst [vmem:[%s189_s11 + $0x34] sm:$0xf] %v236_v13  ;;  %v240_v15 = vld [vmem:[%s1496_s15 + $0x78] sm:$0xf] }
  0x40   : > { %239 = vst [vmem:[%s189_s11 + $0x38] sm:$0xf] %v238_v14  ;;  %241 = vst [vmem:[%s189_s11 + $0x3c] sm:$0xf] %v240_v15 }
  0x41 PF: > { %p990_p5 = scmp.ge.s32.totalorder %s1362_s6, 1  ;;  %p318_p6 = scmp.lt.s32.totalorder %s1362_s6, 5 }
  0x43   : > { %p319_p7 = pnand %p990_p5, %p318_p6 }
  0x44   : > { %s325_s12 = sand.u32 (!%p319_p7), 1, %s1338_s25   ;;  %s1519_s22 = sshll.u32 (!%p319_p7), %s1350_s28, 4 }
  0x45   : > { %322 = sbr.rel (%p319_p7) target bundleno = 662 (0x296), region = 73  ;;  %s991_s21 = sshll.u32 (!%p319_p7), %s325_s12, 6 }
  0x46   : > { %p364_p8 = scmp.lt.s32.totalorder (!%p319_p7), %s1519_s22, 31  ;;  %p369_p9 = scmp.lt.s32.totalorder (!%p319_p7), %s1346_s27, 1 }
  0x47   : > { %s1540_s29 = scalar_lea.vmem (!%p319_p7), [#allocation5], %s991_s21  ;;  %s1661_s19 = sand.u32 (!%p319_p7), 1, %s1330_s24  }
  0x48   : > { %s1544_s26 = scalar_lea.vmem (!%p319_p7), [#allocation6], %s1661_s19  ;;  %p996_p10 = scmp.ne.s32.totalorder (!%p319_p7), %s1346_s27, 0 }
  0x4c   : > { %s365_s7 = scalar_select %p364_p8, %s1519_s22, 31 }
  0x4d   : > { %s1525_s8 = scalar_select %p369_p9, %s1346_s27, 1 }
  0x4e   : > { %s993_s14 = sshll.u32 %s365_s7, 2  ;;  %381 = sbr.rel (%p996_p10) target bundleno = 85 (0x55), region = 81 }
  0x4f   : > { %s367_s11 = scalar_lea.vmem %s1642_s2, %s993_s14  ;;  %s1027_s1 = sshll.u32 %s1525_s8, 6 }
  0x50   : > { %s1534_s12 = scalar_lea.vmem %s1643_s3, %s1027_s1  ;;  %s376_s30 = scalar_lea.vmem %s1644_s4, %s1525_s8  ;;  %v1212_v16 = vld [vmem:[%s367_s11] sm:$0xff] (!%p996_p10)   ;;  %v1213_v17 = vld [vmem:[%s367_s11 + $0x8] sm:$0xff] (!%p996_p10)   ;;  %v1214_v18 = vld [vmem:[%s367_s11 + $0x10] sm:$0xff] (!%p996_p10)  }
  0x51   : > { %446 = vst [vmem:[#allocation2] sm:$0xff] (!%p996_p10), %v1212_v16  ;;  %447 = vst [vmem:[#allocation2 + $0x8] sm:$0xff] (!%p996_p10), %v1213_v17  ;;  %v1215_v19 = vld [vmem:[%s367_s11 + $0x18] sm:$0xff] (!%p996_p10)   ;;  %v1216_v20 = vld [vmem:[%s367_s11 + $0x20] sm:$0xff] (!%p996_p10)  }
  0x52   : > { %448 = vst [vmem:[#allocation2 + $0x10] sm:$0xff] (!%p996_p10), %v1214_v18  ;;  %449 = vst [vmem:[#allocation2 + $0x18] sm:$0xff] (!%p996_p10), %v1215_v19  ;;  %v1217_v21 = vld [vmem:[%s367_s11 + $0x28] sm:$0xff] (!%p996_p10)   ;;  %v1218_v22 = vld [vmem:[%s367_s11 + $0x30] sm:$0xff] (!%p996_p10)  }
  0x53   : > { %450 = vst [vmem:[#allocation2 + $0x20] sm:$0xff] (!%p996_p10), %v1216_v20  ;;  %451 = vst [vmem:[#allocation2 + $0x28] sm:$0xff] (!%p996_p10), %v1217_v21  ;;  %v1219_v23 = vld [vmem:[%s367_s11 + $0x38] sm:$0xff] (!%p996_p10)  }
  0x54   : > { %452 = vst [vmem:[#allocation2 + $0x30] sm:$0xff] (!%p996_p10), %v1218_v22  ;;  %453 = vst [vmem:[#allocation2 + $0x38] sm:$0xff] (!%p996_p10), %v1219_v23 }
  0x55 PF: > { %v1220_v24 = vld [vmem:[%s1534_s12] sm:$0xff]   ;;  %v1221_v25 = vld [vmem:[%s1534_s12 + $0x8] sm:$0xff]   ;;  %v1222_v26 = vld [vmem:[%s1534_s12 + $0x10] sm:$0xff]   ;;  %p1022_p11 = scmp.ne.s32.totalorder %s1346_s27, 1 }
  0x56   : > { %1060 = vmatprep.subr.bf16.mxu0 %v1220_v24  ;;  %v1223_v27 = vld [vmem:[%s1534_s12 + $0x18] sm:$0xff]   ;;  %v1224_v29 = vld [vmem:[%s1534_s12 + $0x20] sm:$0xff]   ;;  %v1225_v30 = vld [vmem:[%s1534_s12 + $0x28] sm:$0xff]  }
  0x57   : > { %1061 = vmatpush3.bf16.msra.mxu0 %v1220_v24  ;;  %v1226_v31 = vld [vmem:[%s1534_s12 + $0x30] sm:$0xff]   ;;  %v1227_v32 = vld [vmem:[%s1534_s12 + $0x38] sm:$0xff]   ;;  %v1228_v40 = vld [vmem:[%s1540_s29] sm:$0xff]  }
  0x58   : > { %1062 = vmatprep.subr.bf16.mxu0 %v1221_v25  ;;  %v454_v28 = vld [vmem:[#allocation2] sm:$0xff]  ;;  %v455_v33 = vld [vmem:[#allocation2 + $0x8] sm:$0xff]  ;;  %1108 = vmatprep.mubr.bf16.mxu1 %v1228_v40  ;;  %v1230_v2 = vld [vmem:[%s1540_s29 + $0x10] sm:$0xff]  }
  0x59   : > { %1076 = vmatprep.mubr.bf16.mxu0 %v454_v28  ;;  %v456_v34 = vld [vmem:[#allocation2 + $0x10] sm:$0xff]  ;;  %v457_v35 = vld [vmem:[#allocation2 + $0x18] sm:$0xff]  ;;  %v1229_v1 = vld [vmem:[%s1540_s29 + $0x8] sm:$0xff]  }
  0x5a   : > { %v458_v36 = vld [vmem:[#allocation2 + $0x20] sm:$0xff]  ;;  %v459_v37 = vld [vmem:[#allocation2 + $0x28] sm:$0xff]  ;;  %v1231_v3 = vld [vmem:[%s1540_s29 + $0x18] sm:$0xff]  }
  0x5b   : > { %1063 = vmatpush3.bf16.msra.mxu0 %v1221_v25  ;;  %v460_v38 = vld [vmem:[#allocation2 + $0x30] sm:$0xff]  ;;  %v461_v39 = vld [vmem:[#allocation2 + $0x38] sm:$0xff]  ;;  %v1232_v4 = vld [vmem:[%s1540_s29 + $0x20] sm:$0xff]  }
  0x5c   : > { %1064 = vmatprep.subr.bf16.mxu0 %v1222_v26  ;;  %v1233_v5 = vld [vmem:[%s1540_s29 + $0x28] sm:$0xff]   ;;  %v1234_v6 = vld [vmem:[%s1540_s29 + $0x30] sm:$0xff]   ;;  %v1235_v7 = vld [vmem:[%s1540_s29 + $0x38] sm:$0xff]   ;;  %s835_s29 = sld [smem:[#allocation4 + %s1350_s28]] (!%p1022_p11) }
  0x5d   : > { %v1013_v8 = vld [vmem:[%s376_s30] ss:$0 sm:$0xff] }
  0x5f   : > { %1065 = vmatpush3.bf16.msra.mxu0 %v1222_v26 }
  0x60   : > { %1066 = vmatprep.subr.bf16.mxu0 %v1223_v27 }
  0x62   : > { %s836_s30 = scvt.s32.f32 (!%p1022_p11), %s835_s29 }
  0x63   : > { %1067 = vmatpush3.bf16.msra.mxu0 %v1223_v27 }
  0x64   : > { %1068 = vmatprep.subr.bf16.mxu0 %v1224_v29 }
  0x67   : > { %1069 = vmatpush3.bf16.msra.mxu0 %v1224_v29 }
  0x68   : > { %1070 = vmatprep.subr.bf16.mxu0 %v1225_v30 }
  0x6b   : > { %1071 = vmatpush3.bf16.msra.mxu0 %v1225_v30 }
  0x6c   : > { %1072 = vmatprep.subr.bf16.mxu0 %v1226_v31 }
  0x6f   : > { %1073 = vmatpush3.bf16.msra.mxu0 %v1226_v31 }
  0x70   : > { %1074 = vmatprep.subr.bf16.mxu0 %v1227_v32 }
  0x73   : > { %1075 = vmatpush3.bf16.msra.mxu0 %v1227_v32 }
  0x76   : > { %1077 = vmatmul.mubr.bf16.vlgmr.msra.gmra.mrb[0].mxu0 %v455_v33 }
  0x77   : > { %1080 = vmatprep.mubr.bf16.mxu0 %v456_v34 }
  0x7e   : > { %1081 = vmatmul.mubr.bf16.gmra.mrb[4].mxu0 %v457_v35 }
  0x7f   : > { %1084 = vmatprep.mubr.bf16.mxu0 %v458_v36 }
  0x86   : > { %1085 = vmatmul.mubr.bf16.gmra.mrb[8].mxu0 %v459_v37 }
  0x87   : > { %1088 = vmatprep.mubr.bf16.mxu0 %v460_v38 }
  0x8e   : > { %1089 = vmatmul.mubr.bf16.gmra.mrb[12].mxu0 %v461_v39 }
 0x149   : > { %v1078_v41 = vpop.f32.mrb[0].mxu0 }
 0x14a   : > { %v560_v42 = vpop.f32.mrb[1].mxu0 }
 0x14b   : > { %v1079_v43 = vpop.f32.mrb[2].mxu0 }
 0x14c   : > { %v624_v44 = vpack.c.bf16 %v1079_v43, %v1078_v41  ;;  %v563_v45 = vpop.f32.mrb[3].mxu0 }
 0x14d   : > { %v623_v46 = vpack.c.bf16 %v563_v45, %v560_v42 }
 0x14f   : > { %1092 = vmatprep.subr.bf16.mxu1 %v623_v46 }
 0x150   : > { %1093 = vmatpush3.bf16.msra.mxu1 %v623_v46 }
 0x151   : > { %v1082_v47 = vpop.f32.mrb[4].mxu0  ;;  %1094 = vmatprep.subr.bf16.mxu1 %v624_v44 }
 0x152   : > { %v576_v48 = vpop.f32.mrb[5].mxu0 }
 0x153   : > { %v1083_v49 = vpop.f32.mrb[6].mxu0 }
 0x154   : > { %v626_v50 = vpack.c.bf16 %v1083_v49, %v1082_v47  ;;  %v579_v51 = vpop.f32.mrb[7].mxu0  ;;  %1095 = vmatpush3.bf16.msra.mxu1 %v624_v44 }
 0x155   : > { %v625_v52 = vpack.c.bf16 %v579_v51, %v576_v48 }
 0x157   : > { %1096 = vmatprep.subr.bf16.mxu1 %v625_v52 }
 0x158   : > { %1097 = vmatpush3.bf16.msra.mxu1 %v625_v52 }
 0x159   : > { %v1086_v53 = vpop.f32.mrb[8].mxu0  ;;  %1098 = vmatprep.subr.bf16.mxu1 %v626_v50 }
 0x15a   : > { %v592_v54 = vpop.f32.mrb[9].mxu0 }
 0x15b   : > { %v1087_v55 = vpop.f32.mrb[10].mxu0 }
 0x15c   : > { %v628_v56 = vpack.c.bf16 %v1087_v55, %v1086_v53  ;;  %v595_v57 = vpop.f32.mrb[11].mxu0  ;;  %1099 = vmatpush3.bf16.msra.mxu1 %v626_v50 }
 0x15d   : > { %v627_v58 = vpack.c.bf16 %v595_v57, %v592_v54 }
 0x15f   : > { %1100 = vmatprep.subr.bf16.mxu1 %v627_v58 }
 0x160   : > { %1101 = vmatpush3.bf16.msra.mxu1 %v627_v58 }
 0x161   : > { %v1090_v59 = vpop.f32.mrb[12].mxu0  ;;  %1102 = vmatprep.subr.bf16.mxu1 %v628_v56 }
 0x162   : > { %v608_v60 = vpop.f32.mrb[13].mxu0 }
 0x163   : > { %v1091_v61 = vpop.f32.mrb[14].mxu0 }
 0x164   : > { %v630_v62 = vpack.c.bf16 %v1091_v61, %v1090_v59  ;;  %v611_v63 = vpop.f32.mrb[15].mxu0  ;;  %1103 = vmatpush3.bf16.msra.mxu1 %v628_v56 }
 0x165   : > { %v629_v0 = vpack.c.bf16 %v611_v63, %v608_v60 }
 0x167   : > { %1104 = vmatprep.subr.bf16.mxu1 %v629_v0 }
 0x168   : > { %1105 = vmatpush3.bf16.msra.mxu1 %v629_v0 }
 0x169   : > { %1106 = vmatprep.subr.bf16.mxu1 %v630_v62 }
 0x16c   : > { %1107 = vmatpush3.bf16.msra.mxu1 %v630_v62 }
 0x16f   : > { %1109 = vmatmul.mubr.bf16.vlgmr.msra.gmra.mrb[0].mxu1 %v1229_v1 }
 0x170   : > { %1112 = vmatprep.mubr.bf16.mxu1 %v1230_v2 }
 0x177   : > { %1113 = vmatmul.mubr.bf16.gmra.mrb[4].mxu1 %v1231_v3 }
 0x178   : > { %1116 = vmatprep.mubr.bf16.mxu1 %v1232_v4 }
 0x17f   : > { %1117 = vmatmul.mubr.bf16.gmra.mrb[8].mxu1 %v1233_v5 }
 0x180   : > { %1120 = vmatprep.mubr.bf16.mxu1 %v1234_v6 }
 0x187   : > { %1121 = vmatmul.mubr.bf16.gmra.mrb[12].mxu1 %v1235_v7 }
 0x242   : > { %v1110_v9 = vpop.f32.mrb[0].mxu1 }
 0x243   : > { %v1568_v10 = vadd.f32 %v1110_v9, %v1013_v8  ;;  %v736_v11 = vpop.f32.mrb[1].mxu1 }
 0x244   : > { %v1570_v12 = vadd.f32 %v1013_v8, %v736_v11  ;;  %v1111_v13 = vpop.f32.mrb[2].mxu1 }
 0x245   : > { %v1572_v14 = vadd.f32 %v1111_v13, %v1013_v8  ;;  %v739_v15 = vpop.f32.mrb[3].mxu1  ;;  %v801_v17 = vmax.f32 %v1568_v10, 0.0 }
 0x246   : > { %v740_v16 = vadd.f32 %v1013_v8, %v739_v15  ;;  %v799_v19 = vmax.f32 %v1570_v12, 0.0  ;;  %v858_v15 = vstv (!%p1022_p11), %s836_s30 }
 0x247   : > { %v802_v18 = vmax.f32 %v1572_v14, 0.0  ;;  %1236 = vrcp.f32 (!%p1022_p11), %v858_v15 }
 0x248   : > { %v800_v20 = vmax.f32 %v740_v16, 0.0 }
 0x249   : > { %v816_v21 = vpack.c.bf16 %v802_v18, %v801_v17 }
 0x24a   : > { %v815_v22 = vpack.c.bf16 %v800_v20, %v799_v19  ;;  %v1114_v23 = vpop.f32.mrb[4].mxu1  ;;  %v837_v1 = vadd.f32 (!%p1022_p11), %v800_v20, %v799_v19 }
 0x24b   : > { %824 = vst [vmem:[#allocation2 + $0x8] sm:$0xff] %v816_v21  ;;  %v761_v24 = vadd.f32 %v1114_v23, %v1013_v8  ;;  %v752_v25 = vpop.f32.mrb[5].mxu1 }
 0x24c   : > { %823 = vst [vmem:[#allocation2] sm:$0xff] %v815_v22  ;;  %v753_v26 = vadd.f32 %v1013_v8, %v752_v25  ;;  %v1115_v27 = vpop.f32.mrb[6].mxu1  ;;  %v838_v2 = vadd.f32 (!%p1022_p11), %v837_v1, %v801_v17 }
 0x24d   : > { %v764_v28 = vadd.f32 %v1115_v27, %v1013_v8  ;;  %v755_v29 = vpop.f32.mrb[7].mxu1  ;;  %v805_v31 = vmax.f32 %v761_v24, 0.0 }
 0x24e   : > { %v756_v30 = vadd.f32 %v1013_v8, %v755_v29  ;;  %v803_v33 = vmax.f32 %v753_v26, 0.0  ;;  %v839_v3 = vadd.f32 (!%p1022_p11), %v838_v2, %v802_v18 }
 0x24f   : > { %v806_v32 = vmax.f32 %v764_v28, 0.0 }
 0x250   : > { %v804_v34 = vmax.f32 %v756_v30, 0.0  ;;  %v840_v4 = vadd.f32 (!%p1022_p11), %v839_v3, %v803_v33 }
 0x251   : > { %v818_v35 = vpack.c.bf16 %v806_v32, %v805_v31  ;;  %v1237_v22 = vpop.eup (!%p1022_p11), %1236 }
 0x252   : > { %v817_v36 = vpack.c.bf16 %v804_v34, %v803_v33  ;;  %v1118_v37 = vpop.f32.mrb[8].mxu1  ;;  %v841_v5 = vadd.f32 (!%p1022_p11), %v840_v4, %v804_v34 }
 0x253   : > { %826 = vst [vmem:[#allocation2 + $0x18] sm:$0xff] %v818_v35  ;;  %v777_v38 = vadd.f32 %v1118_v37, %v1013_v8  ;;  %v768_v39 = vpop.f32.mrb[9].mxu1 }
 0x254   : > { %825 = vst [vmem:[#allocation2 + $0x10] sm:$0xff] %v817_v36  ;;  %v769_v40 = vadd.f32 %v1013_v8, %v768_v39  ;;  %v1119_v41 = vpop.f32.mrb[10].mxu1  ;;  %v842_v6 = vadd.f32 (!%p1022_p11), %v841_v5, %v805_v31 }
 0x255   : > { %v780_v42 = vadd.f32 %v1119_v41, %v1013_v8  ;;  %v771_v43 = vpop.f32.mrb[11].mxu1  ;;  %v809_v45 = vmax.f32 %v777_v38, 0.0 }
 0x256   : > { %v772_v44 = vadd.f32 %v1013_v8, %v771_v43  ;;  %v807_v47 = vmax.f32 %v769_v40, 0.0  ;;  %v843_v7 = vadd.f32 (!%p1022_p11), %v842_v6, %v806_v32 }
 0x257   : > { %v810_v46 = vmax.f32 %v780_v42, 0.0 }
 0x258   : > { %v808_v48 = vmax.f32 %v772_v44, 0.0 }
 0x259   : > { %v820_v49 = vpack.c.bf16 %v810_v46, %v809_v45 }
 0x25a   : > { %v819_v50 = vpack.c.bf16 %v808_v48, %v807_v47  ;;  %v1122_v51 = vpop.f32.mrb[12].mxu1 }
 0x25b   : > { %828 = vst [vmem:[#allocation2 + $0x28] sm:$0xff] %v820_v49  ;;  %v793_v52 = vadd.f32 %v1122_v51, %v1013_v8  ;;  %v784_v53 = vpop.f32.mrb[13].mxu1 }
 0x25c   : > { %827 = vst [vmem:[#allocation2 + $0x20] sm:$0xff] %v819_v50  ;;  %v785_v54 = vadd.f32 %v1013_v8, %v784_v53  ;;  %v1123_v55 = vpop.f32.mrb[14].mxu1 }
 0x25d   : > { %v796_v56 = vadd.f32 %v1123_v55, %v1013_v8  ;;  %v787_v57 = vpop.f32.mrb[15].mxu1  ;;  %v813_v59 = vmax.f32 %v793_v52, 0.0 }
 0x25e   : > { %v788_v58 = vadd.f32 %v1013_v8, %v787_v57  ;;  %v811_v61 = vmax.f32 %v785_v54, 0.0  ;;  %834 = sbr.rel (%p1022_p11) target bundleno = 637 (0x27d), region = 85  ;;  %v844_v8 = vadd.f32 (!%p1022_p11), %v843_v7, %v807_v47 }
 0x25f   : > { %v814_v60 = vmax.f32 %v796_v56, 0.0 }
 0x260   : > { %v812_v62 = vmax.f32 %v788_v58, 0.0  ;;  %v845_v9 = vadd.f32 (!%p1022_p11), %v844_v8, %v808_v48 }
 0x261   : > { %v822_v63 = vpack.c.bf16 %v814_v60, %v813_v59 }
 0x262   : > { %v821_v0 = vpack.c.bf16 %v812_v62, %v811_v61  ;;  %v846_v10 = vadd.f32 (!%p1022_p11), %v845_v9, %v809_v45 }
 0x263   : > { %830 = vst [vmem:[#allocation2 + $0x38] sm:$0xff] %v822_v63 }
 0x264   : > { %829 = vst [vmem:[#allocation2 + $0x30] sm:$0xff] %v821_v0  ;;  %v847_v11 = vadd.f32 (!%p1022_p11), %v846_v10, %v810_v46 }
 0x266   : > { %v848_v12 = vadd.f32 %v847_v11, %v811_v61 }
 0x268   : > { %v849_v13 = vadd.f32 %v848_v12, %v812_v62 }
 0x26a   : > { %v850_v14 = vadd.f32 %v849_v13, %v813_v59 }
 0x26c   : > { %v851_v16 = vadd.f32 %v850_v14, %v814_v60 }
 0x26e   : > { %v852_v19 = vrot.slane %v851_v16, 4 }
 0x270   : > { %v853_v17 = vadd.f32 %v852_v19, %v851_v16 }
 0x272   : > { %v854_v18 = vrot.slane %v853_v17, 2 }
 0x274   : > { %v855_v20 = vadd.f32 %v854_v18, %v853_v17 }
 0x276   : > { %v856_v21 = vrot.slane %v855_v20, 1 }
 0x278   : > { %v857_v23 = vadd.f32 %v856_v21, %v855_v20 }
 0x27a   : > { %v860_v24 = vmul.f32 %v1237_v22, %v857_v23 }
 0x27c   : > { %861 = vst [vmem:[%s1544_s26] sm:$0x1] %v860_v24 }
 0x27d PF: > { %s1584_s10 = scalar_lea.hbm %s1645_s5, %s1519_s22  ;;  %s875_s19 = sshll.u32 %s1544_s26, 4  ;;  %s876_s19 = int_to_ptr.vmem [resolvable:$true] %s875_s19 }
 0x27e   : > { %s1662_s20 = sand.u32 1, %s1330_s24   ;;  %s1250_s7 = scalar_lea.vmem %s876_s19, 16 }
 0x27f   : > { %s863_s21 = scalar_lea.sflag [#allocation7], %s1662_s20  ;;  %p1251_p12 = scmp.ne.s32.totalorder %s876_s19, %s1250_s7 }
 0x280   : > { %s1365_s8 = smov [#allocation6]  }
 0x281   : > { %p1252_p0 = pnand %p1251_p12, %p1470_p13  ;;  %s1254_s14 = sshll.u32 %s1365_s8, 4  ;;  %s1255_s14 = int_to_ptr.vmem [resolvable:$false] %s1254_s14 }
 0x282   : > { %s1256_s16 = scalar_lea.vmem %s1255_s14, 32  ;;  %p1257_p2 = scmp.lt.s32.totalorder %s876_s19, %s1255_s14 }
 0x283   : > { %p1253_p1 = pneg %p1252_p0  ;;  %p1258_p4 = scmp.lt.s32.totalorder %s1256_s16, %s1250_s7 }
 0x285   : > { %p1259_p5 = por %p1258_p4, %p1257_p2 }
 0x287   : > { %p1260_p6 = pnand %p1259_p5, %p1253_p1 }
 0x289   : > { %1263 = shalt.err (!%p1260_p6)
}
 0x28a   : > { %s1264_s26 = scalar_lea.hbm %s1584_s10, 16  ;;  %s1268_s11 = scalar_lea.hbm %s1645_s5, 32 }
 0x28b   : > { %p1265_p7 = scmp.ne.s32.totalorder %s1584_s10, %s1264_s26  ;;  %p1269_p10 = scmp.lt.u32.totalorder %s1584_s10, %s1645_s5 }
 0x28c   : > { %p1270_p11 = scmp.lt.u32.totalorder %s1268_s11, %s1264_s26  ;;  %p1272_p0 = scmp.lt.u32.totalorder %s1264_s26, %s1584_s10 }
 0x28d   : > { %p1266_p8 = pnand %p1265_p7, %p1470_p13 }
 0x28e   : > { %p1271_p12 = por %p1270_p11, %p1269_p10 }
 0x28f   : > { %p1267_p9 = pneg %p1266_p8 }
 0x290   : > { %p1273_p1 = por %p1272_p0, %p1271_p12 }
 0x292   : > { %p1274_p2 = pnand %p1273_p1, %p1267_p9 }
 0x294   : > { %1277 = shalt.err (!%p1274_p2)
}
 0x295   : > { %1124 = dma.vmem_to_hbm [thread:$0]  (%p1470_p13), %s876_s19, 16, %s1584_s10, %s863_s21  }
 0x296 PF: > { %p1130_p4 = scmp.ge.s32.totalorder %s1362_s6, 2  ;;  %s887_s1 = sand.u32 1, %s1326_s23  }
 0x297   : > { %s888_s9 = scalar_lea.sflag [#allocation7], %s887_s1 }
 0x298   : > { %p1127_p5 = pnand %p1130_p4, %p1477_p3 }
 0x29a   : > { %1321 = dma.done.wait (!%p1127_p5), %s888_s9, 16  }
 0x29b   : > { %1323 = vsyncadd (!%p1127_p5), %s888_s9, 4294967280  ;;  %s24_s6 = sadd.s32 1, %s1362_s6   ;;  %s1663_s25 = sld [smem:[#allocation10_spill]] }
 0x29c   : > { %p21_p6 = scmp.ge.s32.totalorder %s24_s6, 6   ;;  %s1664_s26 = sld [smem:[#allocation15_spill]] }
 0x29d   : > { %s1665_s27 = sld [smem:[#allocation11_spill]]  ;;  %s1666_s28 = sld [smem:[#allocation12_spill]] }
 0x29e   : > { %s1667_s29 = sld [smem:[#allocation13_spill]]  ;;  %s1668_s30 = sld [smem:[#allocation14_spill]] }
 0x29f   : > { %s1669_s23 = smov %s1330_s24  ;;  %s1670_s24 = smov %s1334_s0 }
 0x2a0   : > { %s1671_s0 = smov %s1482_s18  ;;  %23 = sbr.rel (!%p21_p6) target bundleno = 21 (0x15), region = 134 }
 0x2a7   :  { %892 = vsyncpa [#allocation7], 1 }
 0x2a8   :  { %894 = vsyncpa [#allocation7 + $0x1], 1 }

</bundles_post_ra>
